<compile_context>
chip_gen: v7x
topology: tpu7x:2x2x1
jax: 0.10.0
libtpu: 0.0.40
codegen_flags: <defaults>
</compile_context>

<pallas_src>
import functools

import jax
import jax.numpy as jnp
from jax.experimental import pallas as pl
from jax.experimental.pallas import tpu as pltpu


def _round_up(n, m):
    return ((n + m - 1) // m) * m


def _vmem_cap_bytes():
    """Generation-aware scoped-VMEM cap (3/4 of physical, conservative fallback)."""
    try:
        phys = int(pltpu.get_tpu_info().vmem_capacity_bytes)
    except Exception:
        phys = 64 << 20  # v7x-sized conservative fallback
    return max(phys * 3 // 4, 16 << 20)


def _resident_spec(shape):
    """Constant-index (VMEM-resident) BlockSpec, single-buffered if supported."""
    try:
        return pl.BlockSpec(shape, lambda i: (0, 0), pipeline_mode=pl.Buffered(1))
    except TypeError:  # older BlockSpec signature without pipeline_mode
        return pl.BlockSpec(shape, lambda i: (0, 0))


def _predict_kernel(x_ref, w1_ref, b1_ref, w2_ref, b2_ref, out_ref, *, n_classes):
    # Cast x to bf16 in-kernel (saves a separate HBM cast pass in the wrapper).
    x = x_ref[...].astype(jnp.bfloat16)

    # Layer 1: [TB, F](bf16) @ [F, Hp](bf16) -> f32 accumulate, bias + ReLU in f32.
    h = jnp.dot(x, w1_ref[...], preferred_element_type=jnp.float32)
    h = jnp.maximum(h + b1_ref[...], 0.0)

    # Layer 2: [TB, Hp](bf16) @ [Hp, Cp](bf16) -> f32 accumulate, bias in f32.
    logits = jnp.dot(h.astype(jnp.bfloat16), w2_ref[...],
                     preferred_element_type=jnp.float32)
    logits = logits + b2_ref[...]          # padded classes carry bias -1e30

    # Numerically stable, exact softmax over the padded (lane-dense) class axis.
    m = jnp.max(logits, axis=-1, keepdims=True)
    e = jnp.exp(logits - m)                # exp(-1e30 - m) == 0 on pad lanes
    denom = jnp.sum(e, axis=-1, keepdims=True)
    probs = e / denom                      # exact normalization (rows sum to 1)

    # Store only the real classes -> no output write amplification.
    out_ref[...] = probs[:, :n_classes].astype(out_ref.dtype)


def prepare_params(w1, b1, w2, b2):
    """One-time (export-time) weight prep: bf16 cast + lane-dim padding.

    Hoisted out of the per-call path so weights are not re-read/re-cast in HBM
    on every predict() call.
    """
    F, H = w1.shape
    C = w2.shape[1]
    h_pad = _round_up(H, 128)
    c_pad = _round_up(C, 128)

    w1p = jnp.zeros((F, h_pad), jnp.bfloat16).at[:, :H].set(w1.astype(jnp.bfloat16))
    b1p = jnp.zeros((1, h_pad), jnp.float32).at[:, :H].set(
        jnp.reshape(b1, (1, H)).astype(jnp.float32))
    w2p = jnp.zeros((h_pad, c_pad), jnp.bfloat16).at[:H, :C].set(w2.astype(jnp.bfloat16))
    # Padded classes get a huge negative bias so softmax over the padded axis is
    # exact for the real classes (pad-class probabilities are exactly 0).
    b2p = jnp.full((1, c_pad), -1e30, jnp.float32).at[:, :C].set(
        jnp.reshape(b2, (1, C)).astype(jnp.float32))
    return w1p, b1p, w2p, b2p, C


@functools.partial(jax.jit, static_argnames=("n_classes", "tb"))
def export_model_predict(x, w1p, b1p, w2p, b2p, *, n_classes, tb=1024):
    """Pallas implementation of ExportModel.forward == model.predict(x)."""
    B, F = x.shape
    h_pad = w1p.shape[1]
    c_pad = w2p.shape[1]
    C = n_classes

    # Batch tiling: 16-row aligned (bf16 packs 2 rows/sublane), chosen to divide
    # the (lightly) padded batch so no worst-case tile padding, and split so the
    # grid keeps >=2 steps for v7x's two TensorCores when the batch is large.
    b_pad = _round_up(B, 16)
    tb_target = min(tb, b_pad)
    if b_pad >= 512:
        tb_target = min(tb_target, max(16, (b_pad // 2 // 16) * 16))
    tb_eff = max(16, (tb_target // 16) * 16)
    while b_pad % tb_eff != 0:
        tb_eff -= 16
    grid = (b_pad // tb_eff,)

    if b_pad != B:
        x = jnp.pad(x, ((0, b_pad - B), (0, 0)))
    x = x.astype(jnp.float32)

    # VMEM budget: double-buffered f32 x / f32 out tiles + single-buffered
    # resident weights/biases + headroom for f32 intermediates.
    x_bytes = 2 * tb_eff * F * 4
    out_bytes = 2 * tb_eff * C * 4
    w_bytes = (F * h_pad + h_pad * c_pad) * 2 + (h_pad + c_pad) * 4
    scratch = 2 * tb_eff * (h_pad + c_pad) * 4
    vmem_need = x_bytes + out_bytes + w_bytes + scratch
    vmem_limit = int(min(max(vmem_need * 5 // 4 + (4 << 20), 8 << 20),
                         _vmem_cap_bytes()))

    cost = pl.CostEstimate(
        flops=2 * b_pad * (F * h_pad + h_pad * c_pad),
        transcendentals=b_pad * c_pad,
        bytes_accessed=b_pad * F * 4 + w_bytes + b_pad * C * 4,
    )

    out_padded = pl.pallas_call(
        functools.partial(_predict_kernel, n_classes=C),
        out_shape=jax.ShapeDtypeStruct((b_pad, C), jnp.float32),
        grid=grid,
        in_specs=[
            pl.BlockSpec((tb_eff, F), lambda i: (i, 0)),   # x: tiled over batch
            _resident_spec((F, h_pad)),                    # w1: VMEM-resident
            _resident_spec((1, h_pad)),                    # b1: VMEM-resident
            _resident_spec((h_pad, c_pad)),                # w2: VMEM-resident
            _resident_spec((1, c_pad)),                    # b2: VMEM-resident
        ],
        out_specs=pl.BlockSpec((tb_eff, C), lambda i: (i, 0)),
        compiler_params=pltpu.CompilerParams(
            dimension_semantics=("parallel",),
            vmem_limit_bytes=vmem_limit,
        ),
        cost_estimate=cost,
    )(x, w1p, b1p, w2p, b2p)

    return out_padded[:B, :]


def _reference_predict(x, w1, b1, w2, b2):
    h = jnp.maximum(x @ w1 + jnp.reshape(b1, (1, -1)), 0.0)
    logits = h @ w2 + jnp.reshape(b2, (1, -1))
    return jax.nn.softmax(logits, axis=-1)


if __name__ == "__main__":
    batch, in_features, hidden, n_classes = 8, 32, 64, 16

    key = jax.random.PRNGKey(0)
    kx, kw1, kb1, kw2, kb2 = jax.random.split(key, 5)

    x = jax.random.normal(kx, (batch, in_features), dtype=jnp.float32)
    w1 = jax.random.normal(kw1, (in_features, hidden), dtype=jnp.float32) * 0.1
    b1 = jax.random.normal(kb1, (1, hidden), dtype=jnp.float32) * 0.1
    w2 = jax.random.normal(kw2, (hidden, n_classes), dtype=jnp.float32) * 0.1
    b2 = jax.random.normal(kb2, (1, n_classes), dtype=jnp.float32) * 0.1

    # One-time (export-time) weight preparation, hoisted out of the call path.
    w1p, b1p, w2p, b2p, C = prepare_params(w1, b1, w2, b2)

    out = export_model_predict(x, w1p, b1p, w2p, b2p, n_classes=C)
    jax.block_until_ready(out)

    ref = _reference_predict(x, w1, b1, w2, b2)
    assert out.shape == (batch, n_classes)
    # bf16 MXU operands -> bf16-appropriate tolerance on probabilities.
    assert jnp.allclose(out, ref, atol=1e-2, rtol=1e-2)
    # Exact f32 normalization -> rows sum to 1.
    assert jnp.allclose(jnp.sum(out, axis=-1), 1.0, atol=1e-3)

    print("KERNEL_OK")
</pallas_src>

<mosaic_0001>
module attributes {stable_mosaic.version = 11 : i64} {
  func.func @_predict_kernel(%arg0: i32, %arg1: memref<16x32xf32, #tpu.memory_space<vmem>>, %arg2: memref<32x128xbf16, #tpu.memory_space<vmem>>, %arg3: memref<1x128xf32, #tpu.memory_space<vmem>>, %arg4: memref<128x128xbf16, #tpu.memory_space<vmem>>, %arg5: memref<1x128xf32, #tpu.memory_space<vmem>>, %arg6: memref<16x16xf32, #tpu.memory_space<vmem>>) attributes {dimension_semantics = [#tpu.dimension_semantics<parallel>], iteration_bounds = array<i64: 1>, scalar_prefetch = 0 : i64, scratch_operands = 0 : i64, tpu.core_type = #tpu.core_type<tc>, window_params = [{transform_indices = @transform_0, window_bounds = array<i64: 16, 32>}, {pipeline_mode = #tpu.pipeline_mode<synchronous>, transform_indices = @transform_1, window_bounds = array<i64: 32, 128>}, {pipeline_mode = #tpu.pipeline_mode<synchronous>, transform_indices = @transform_2, window_bounds = array<i64: 1, 128>}, {pipeline_mode = #tpu.pipeline_mode<synchronous>, transform_indices = @transform_3, window_bounds = array<i64: 128, 128>}, {pipeline_mode = #tpu.pipeline_mode<synchronous>, transform_indices = @transform_4, window_bounds = array<i64: 1, 128>}, {transform_indices = @transform_5, window_bounds = array<i64: 16, 16>}]} {
    %c0 = arith.constant 0 : index
    %c0_0 = arith.constant 0 : index
    %0 = vector.load %arg1[%c0, %c0_0] : memref<16x32xf32, #tpu.memory_space<vmem>>, vector<16x32xf32>
    %1 = arith.truncf %0 : vector<16x32xf32> to vector<16x32xbf16>
    %c0_1 = arith.constant 0 : index
    %c0_2 = arith.constant 0 : index
    %2 = vector.load %arg2[%c0_1, %c0_2] : memref<32x128xbf16, #tpu.memory_space<vmem>>, vector<32x128xbf16>
    %cst = arith.constant dense<0.000000e+00> : vector<16x128xf32>
    %3 = tpu.matmul %1, %2, %cst {dimension_numbers = #tpu.dot_dimension_numbers<[1], [0], [0], [1], [0, 0, 1, 1], [], []>} : vector<16x32xbf16>, vector<32x128xbf16>, vector<16x128xf32> -> vector<16x128xf32>
    %c0_3 = arith.constant 0 : index
    %c0_4 = arith.constant 0 : index
    %4 = vector.load %arg3[%c0_3, %c0_4] : memref<1x128xf32, #tpu.memory_space<vmem>>, vector<1x128xf32>
    %5 = vector.broadcast %4 : vector<1x128xf32> to vector<16x128xf32>
    %6 = arith.addf %3, %5 : vector<16x128xf32>
    %cst_5 = arith.constant 0.000000e+00 : f32
    %7 = vector.broadcast %cst_5 : f32 to vector<16x128xf32>
    %8 = arith.maximumf %6, %7 : vector<16x128xf32>
    %9 = arith.truncf %8 : vector<16x128xf32> to vector<16x128xbf16>
    %c0_6 = arith.constant 0 : index
    %c0_7 = arith.constant 0 : index
    %10 = vector.load %arg4[%c0_6, %c0_7] : memref<128x128xbf16, #tpu.memory_space<vmem>>, vector<128x128xbf16>
    %cst_8 = arith.constant dense<0.000000e+00> : vector<16x128xf32>
    %11 = tpu.matmul %9, %10, %cst_8 {dimension_numbers = #tpu.dot_dimension_numbers<[1], [0], [0], [1], [0, 0, 1, 1], [], []>} : vector<16x128xbf16>, vector<128x128xbf16>, vector<16x128xf32> -> vector<16x128xf32>
    %c0_9 = arith.constant 0 : index
    %c0_10 = arith.constant 0 : index
    %12 = vector.load %arg5[%c0_9, %c0_10] : memref<1x128xf32, #tpu.memory_space<vmem>>, vector<1x128xf32>
    %13 = vector.broadcast %12 : vector<1x128xf32> to vector<16x128xf32>
    %14 = arith.addf %11, %13 : vector<16x128xf32>
    %cst_11 = arith.constant dense<0xFF800000> : vector<16xf32>
    %15 = vector.multi_reduction <maximumf>, %14, %cst_11 [1] : vector<16x128xf32> to vector<16xf32>
    %16 = vector.shape_cast %15 : vector<16xf32> to vector<16x1xf32>
    %17 = vector.broadcast %16 : vector<16x1xf32> to vector<16x128xf32>
    %18 = arith.subf %14, %17 : vector<16x128xf32>
    %19 = math.exp %18 : vector<16x128xf32>
    %cst_12 = arith.constant dense<0.000000e+00> : vector<16xf32>
    %20 = vector.multi_reduction <add>, %19, %cst_12 [1] : vector<16x128xf32> to vector<16xf32>
    %21 = vector.shape_cast %20 : vector<16xf32> to vector<16x1xf32>
    %22 = vector.broadcast %21 : vector<16x1xf32> to vector<16x128xf32>
    %23 = arith.divf %19, %22 : vector<16x128xf32>
    %24 = vector.extract_strided_slice %23 {offsets = [0, 0], sizes = [16, 16], strides = [1, 1]} : vector<16x128xf32> to vector<16x16xf32>
    %c0_13 = arith.constant 0 : index
    %c0_14 = arith.constant 0 : index
    %25 = vector.load %arg6[%c0_13, %c0_14] : memref<16x16xf32, #tpu.memory_space<vmem>>, vector<16x16xf32>
    tpu.vector_store %arg6[%c0_13, %c0_14], %24 {strides = array<i32>} : memref<16x16xf32, #tpu.memory_space<vmem>>, vector<16x16xf32>,
    return
  }
  func.func @transform_0(%arg0: i32) -> (i32, i32) {
    %c0_i32 = arith.constant 0 : i32
    %c0_i32_0 = arith.constant 0 : i32
    return %arg0, %c0_i32 : i32, i32
  }
  func.func @transform_1(%arg0: i32) -> (i32, i32) {
    %c0_i32 = arith.constant 0 : i32
    %c0_i32_0 = arith.constant 0 : i32
    %c0_i32_1 = arith.constant 0 : i32
    return %c0_i32, %c0_i32_0 : i32, i32
  }
  func.func @transform_2(%arg0: i32) -> (i32, i32) {
    %c0_i32 = arith.constant 0 : i32
    %c0_i32_0 = arith.constant 0 : i32
    %c0_i32_1 = arith.constant 0 : i32
    return %c0_i32, %c0_i32_0 : i32, i32
  }
  func.func @transform_3(%arg0: i32) -> (i32, i32) {
    %c0_i32 = arith.constant 0 : i32
    %c0_i32_0 = arith.constant 0 : i32
    %c0_i32_1 = arith.constant 0 : i32
    return %c0_i32, %c0_i32_0 : i32, i32
  }
  func.func @transform_4(%arg0: i32) -> (i32, i32) {
    %c0_i32 = arith.constant 0 : i32
    %c0_i32_0 = arith.constant 0 : i32
    %c0_i32_1 = arith.constant 0 : i32
    return %c0_i32, %c0_i32_0 : i32, i32
  }
  func.func @transform_5(%arg0: i32) -> (i32, i32) {
    %c0_i32 = arith.constant 0 : i32
    %c0_i32_0 = arith.constant 0 : i32
    return %arg0, %c0_i32 : i32, i32
  }
}

</mosaic_0001>

<bundles_post_ra>
// kernel: export_model_predict.1
= control target key start
LH: loop header
LB: loop body
LE: loop exit
PB: predicated region body
PF: predicated region fallthrough
CT: control target
= control target key end

     0   :  { %10 = vsyncpa [#allocation3], 0  ;;  %s347_s18 = smov [#allocation2]   ;;  %s418_s0 = inlined_call_operand.vmem [shape: f32[16,32], index: 0, kind: input, shape index: {}]   ;;  %s419_s1 = inlined_call_operand.vmem [shape: bf16[32,128], index: 1, kind: input, shape index: {}]   ;;  %s420_s2 = inlined_call_operand.vmem [shape: f32[1,128], index: 2, kind: input, shape index: {}]   ;;  %s421_s3 = inlined_call_operand.hbm [shape: bf16[128,128], index: 3, kind: input, shape index: {}]   ;;  %s422_s4 = inlined_call_operand.vmem [shape: f32[1,128], index: 4, kind: input, shape index: {}]   ;;  %s423_s5 = inlined_call_operand.vmem [shape: f32[16,16], index: 5, kind: output, shape index: {}]  }
   0x1   :  { %s22_s19 = sshll.u32 %s347_s18, 4  ;;  %s323_s22 = scalar_lea.hbm %s421_s3, 1024  ;;  %s23_s19 = int_to_ptr.vmem [resolvable:$true] %s22_s19 }
   0x2   :  { %p324_p0 = scmp.ne.s32.totalorder %s421_s3, %s323_s22  ;;  %p327_p1 = scmp.lt.u32.totalorder %s323_s22, %s421_s3 }
   0x4   :  { %p329_p2 = pnand %p327_p1, %p324_p0 }
   0x6   :  { %332 = shalt.err (!%p329_p2)
}
   0x7   :  { %s333_s27 = scalar_lea.vmem %s23_s19, 1024  ;;  %p338_p4 = scmp.lt.s32.totalorder %s23_s19, %s23_s19 }
   0x8   :  { %p334_p3 = scmp.ne.s32.totalorder %s23_s19, %s333_s27  ;;  %p339_p5 = scmp.lt.s32.totalorder %s333_s27, %s333_s27 }
   0xa   :  { %p340_p6 = por %p339_p5, %p338_p4 }
   0xc   :  { %p341_p7 = pnand %p340_p6, %p334_p3 }
   0xe   :  { %344 = shalt.err (!%p341_p7)
}
   0xf   :  { %s348_s28 = smov 64   ;;  %s349_s29 = smov 4  }
  0x10   :  { %28 = dma.hbm_to_vmem [thread:$0]  %s421_s3, 1024, %s23_s19, [#allocation3], %s348_s28, %s348_s28, %s349_s29  }
  0x11   :  { %345 = dma.done.wait [#allocation3], 1024  }
  0x12   :  { %346 = vsyncadd [#allocation3], 4294966272  ;;  %v350_v0 = vmov 0.0   ;;  %vm351_vm0 = vmmov 0   ;;  %v305_v1 = vld [vmem:[%s419_s1] sm:$0xff]   ;;  %v306_v2 = vld [vmem:[%s419_s1 + $0x8] sm:$0xff]  }
  0x13   :  { %272 = vmatprep.subr.bf16.mxu0 %v350_v0  ;;  %276 = vmatprep.mubr.msk.bf16.mxu0 %vm351_vm0, %v350_v0  ;;  %v35_v3 = vld [vmem:[%s418_s0] sm:$0xff]  ;;  %v36_v4 = vld [vmem:[%s418_s0 + $0x8] sm:$0xff]  ;;  %v307_v5 = vld [vmem:[#allocation2] sm:$0xff]   ;;  %vm61_vm1 = vcmask 261120   ;;  %vm239_vm2 = vcmask 130048  }
  0x14   :  { %280 = vmatprep.subr.bf16.mxu1 %v350_v0  ;;  %296 = vmatprep.mubr.msk.bf16.mxu1 %vm351_vm0, %v350_v0  ;;  %v37_v6 = vpack.c.bf16 %v36_v4, %v35_v3  ;;  %v308_v7 = vld [vmem:[#allocation2 + $0x8] sm:$0xff]   ;;  %v309_v8 = vld [vmem:[#allocation2 + $0x10] sm:$0xff]   ;;  %v310_v9 = vld [vmem:[#allocation2 + $0x18] sm:$0xff]  }
  0x15   :  { %273 = vmatpush3.bf16.msra.mxu0 %v305_v1  ;;  %281 = vmatpush3.bf16.msra.mxu1 %v307_v5  ;;  %v311_v10 = vld [vmem:[#allocation2 + $0x20] sm:$0xff]   ;;  %v312_v11 = vld [vmem:[#allocation2 + $0x28] sm:$0xff]   ;;  %v313_v12 = vld [vmem:[#allocation2 + $0x30] sm:$0xff]  }
  0x16   :  { %274 = vmatprep.subr.bf16.mxu0 %v350_v0  ;;  %282 = vmatprep.subr.bf16.mxu1 %v350_v0  ;;  %v314_v13 = vld [vmem:[#allocation2 + $0x38] sm:$0xff]   ;;  %v247_v14 = vld [vmem:[%s420_s2] ss:$0 sm:$0xff] }
  0x17   :  { %v251_v24 = vld [vmem:[%s422_s4] ss:$0 sm:$0xff] }
  0x19   :  { %275 = vmatpush3.bf16.msra.mxu0 %v306_v2  ;;  %283 = vmatpush3.bf16.msra.mxu1 %v308_v7 }
  0x1a   :  { %284 = vmatprep.subr.bf16.mxu1 %v350_v0 }
  0x1c   :  { %277 = vmatmul.mubr.msk.bf16.vlgmr.msra.gmra.mrb[0].mxu0 %vm61_vm1, %v37_v6 }
  0x1d   :  { %285 = vmatpush3.bf16.msra.mxu1 %v309_v8 }
  0x1e   :  { %286 = vmatprep.subr.bf16.mxu1 %v350_v0 }
  0x21   :  { %287 = vmatpush3.bf16.msra.mxu1 %v310_v9 }
  0x22   :  { %288 = vmatprep.subr.bf16.mxu1 %v350_v0 }
  0x25   :  { %289 = vmatpush3.bf16.msra.mxu1 %v311_v10 }
  0x26   :  { %290 = vmatprep.subr.bf16.mxu1 %v350_v0 }
  0x29   :  { %291 = vmatpush3.bf16.msra.mxu1 %v312_v11 }
  0x2a   :  { %292 = vmatprep.subr.bf16.mxu1 %v350_v0 }
  0x2d   :  { %293 = vmatpush3.bf16.msra.mxu1 %v313_v12 }
  0x2e   :  { %294 = vmatprep.subr.bf16.mxu1 %v350_v0 }
  0x31   :  { %295 = vmatpush3.bf16.msra.mxu1 %v314_v13 }
  0xef   :  { %v99_v15 = vpop.f32.mrb[0].mxu0 }
  0xf0   :  { %v100_v16 = vadd.f32 %v247_v14, %v99_v15  ;;  %v278_v17 = vpop.f32.mrb[1].mxu0 }
  0xf1   :  { %v102_v18 = vpop.f32.mrb[2].mxu0 }
  0xf2   :  { %v103_v19 = vadd.f32 %v247_v14, %v102_v18  ;;  %v279_v20 = vpop.f32.mrb[3].mxu0  ;;  %v106_v21 = vmax.f32 %v100_v16, 0.0 }
  0xf4   :  { %v107_v22 = vmax.f32 %v103_v19, 0.0 }
  0xf6   :  { %v108_v23 = vpack.c.bf16 %v107_v22, %v106_v21 }
  0xf8   :  { %297 = vmatmul.mubr.bf16.vlgmr.msra.gmra.mrb[0].mxu1 %v108_v23 }
 0x1cb   :  { %v214_v25 = vpop.f32.mrb[0].mxu1 }
 0x1cc   :  { %v215_v26 = vadd.f32 %v251_v24, %v214_v25  ;;  %v298_v27 = vpop.f32.mrb[1].mxu1 }
 0x1cd   :  { %v217_v28 = vpop.f32.mrb[2].mxu1 }
 0x1ce   :  { %221 = vmax.xlane.f32.xlu0 %v215_v26  ;;  %v299_v29 = vpop.f32.mrb[3].mxu1  ;;  %v218_v30 = vadd.f32 %v251_v24, %v217_v28 }
 0x1d2   :  { %223 = vmax.xlane.f32.xlu0 %v218_v30 }
 0x25b   :  { %v222_v31 = vpop.xlane.xlu0 %221 }
 0x25c   :  { %v225_v32 = vsub.f32 %v215_v26, %v222_v31 }
 0x25e   :  { %v227_v33 = vmul.f32 1.442695, %v225_v32 }
 0x25f   :  { %v224_v34 = vpop.xlane.xlu0 %223 }
 0x260   :  { %315 = vpow2.f32 %v227_v33  ;;  %v226_v35 = vsub.f32 %v218_v30, %v224_v34 }
 0x262   :  { %v229_v36 = vmul.f32 1.442695, %v226_v35 }
 0x264   :  { %317 = vpow2.f32 %v229_v36 }
 0x26a   :  { %v316_v37 = vpop.eup %315 }
 0x26b   :  { %231 = vadd.xlane.f32.xlu1 %v316_v37 }
 0x26e   :  { %v318_v38 = vpop.eup %317 }
 0x26f   :  { %233 = vadd.xlane.f32.xlu1 %v318_v38 }
 0x2f8   :  { %v232_v39 = vpop.xlane.xlu1 %231 }
 0x2f9   :  { %319 = vrcp.f32 %v232_v39 }
 0x2fc   :  { %v234_v40 = vpop.xlane.xlu1 %233 }
 0x2fd   :  { %321 = vrcp.f32 %v234_v40 }
 0x303   :  { %v320_v41 = vpop.eup %319 }
 0x304   :  { %v236_v42 = vmul.f32 %v320_v41, %v316_v37 }
 0x306   :  { %240 = vst.msk [vmem:[%s423_s5] sm:$0xff] %vm239_vm2, %v236_v42 }
 0x307   :  { %v322_v43 = vpop.eup %321 }
 0x308   :  { %v238_v44 = vmul.f32 %v322_v43, %v318_v38 }
 0x30a   :  { %241 = vst.msk [vmem:[%s423_s5 + $0x8] sm:$0xff] %vm239_vm2, %v238_v44 }
 0x30b   :  { %246 = vsyncpa [#allocation3], 1 }

</bundles_post_ra>
